<compile_context>
chip_gen: v7x
topology: tpu7x:2x2x1
jax: 0.10.0
libtpu: 0.0.40
codegen_flags: <defaults>
</compile_context>

<pallas_src>
import jax
import jax.numpy as jnp
import numpy as np
from jax.experimental import pallas as pl
from jax.experimental.pallas import tpu as pltpu


SUBLANE = 16                         # accumulator strip rows (f32/bf16 safe)
TARGET_BLOCK_ELEMS = 1024 * 1024     # ~4 MiB f32 per input block
VMEM_LIMIT_BYTES = 32 * 1024 * 1024  # 2 inputs x 2 bufs x 4 MiB = 16 MiB << 32 MiB
SMALL_KL_ELEMS = 1 << 20             # below this, KL uses one fused XLA reduce


def _cdiv(a, b):
    return -(-a // b)


def _num_parallel_slots():
    """2 slots only on multi-TensorCore chips (v4/v5p/v7x); 1 on v5e/v6e."""
    try:
        kind = (jax.devices()[0].device_kind or "").lower()
    except Exception:
        return 1
    if any(t in kind for t in ("v5e", "v6e", "lite", "v2", "v3")):
        return 1
    if any(t in kind for t in ("v4", "v5p", "7")):
        return 2
    return 1


def _choose_lane(n):
    for lane in (1024, 512, 256, 128):
        if n % lane == 0:
            return lane
    return None


def _choose_block_rows(rows, lane):
    cap = max(SUBLANE, (TARGET_BLOCK_ELEMS // lane) // SUBLANE * SUBLANE)
    if rows <= cap:
        return rows          # single block == full array dims (always legal)
    return cap               # multiple of SUBLANE (>= 8), legal block dim


# ----------------------------------------------------------------------------
# Elementwise contributions (computed in f32 inside the kernel)
# ----------------------------------------------------------------------------
def _abs_elem(x, xr):
    return jnp.abs(x - xr)


def _kl_elem(mu, lv_raw):
    lv = jnp.clip(lv_raw, -30.0, 20.0)           # matches ldm's logvar clamp
    return mu * mu + jnp.exp(lv) - 1.0 - lv      # zero for zero-padded inputs


# ----------------------------------------------------------------------------
# Kernel factory: map a pair of blocks -> strip accumulator -> scalar per slot
# ----------------------------------------------------------------------------
def _make_sum_kernel(elem_fn, block_rows, lane, strip_rows, total_rows,
                     needs_mask, final_scale):
    groups = block_rows // strip_rows

    def kernel(a_ref, b_ref, out_ref, acc_ref):
        i = pl.program_id(1)

        @pl.when(i == 0)
        def _():
            acc_ref[...] = jnp.zeros_like(acc_ref)

        val = elem_fn(a_ref[...].astype(jnp.float32),
                      b_ref[...].astype(jnp.float32))

        if needs_mask:
            # Mask rows past the true extent (partial tail block or a clamped
            # duplicate block on the extra parallel slot).
            blk = pl.program_id(0) * pl.num_programs(1) + i
            row0 = blk * block_rows
            row_ids = jax.lax.broadcasted_iota(jnp.int32, (block_rows, lane), 0)
            val = jnp.where(row0 + row_ids < total_rows, val, 0.0)

        if groups == 1:
            acc_ref[...] += val
        else:
            # Strip-wise accumulation: (G, strip, lane) summed over G = VALU adds.
            acc_ref[...] += jnp.sum(val.reshape(groups, strip_rows, lane), axis=0)

        @pl.when(i == pl.num_programs(1) - 1)
        def _():
            total = jnp.sum(acc_ref[...])
            if final_scale != 1.0:
                total = final_scale * total
            out_ref[0, 0] = total

    return kernel


# ----------------------------------------------------------------------------
# Full-tensor sum reduction of elem_fn(a, b) via large lane-dense tiles
# ----------------------------------------------------------------------------
def _tiled_pair_sum(elem_fn, final_scale, a, b, *, flops_per_elem=3,
                    transcendentals_per_elem=0):
    assert a.shape == b.shape
    n = int(np.prod(a.shape))
    af = a.reshape(-1)
    bf = b.reshape(-1)

    lane = _choose_lane(n)
    if lane is None:
        # TODO(synk): truly ragged sizes (numel % 128 != 0) pay one small padded
        # copy; padding contributes exactly 0 to both reductions.
        lane = 128
        pad = (-n) % lane
        af = jnp.pad(af, (0, pad))
        bf = jnp.pad(bf, (0, pad))

    rows = af.shape[0] // lane
    av = af.reshape(rows, lane)      # bitcast-style reshape, no HBM copy
    bv = bf.reshape(rows, lane)

    num_slots = _num_parallel_slots()
    block_rows = _choose_block_rows(rows, lane)
    nblocks = _cdiv(rows, block_rows)
    steps = _cdiv(nblocks, num_slots)
    needs_mask = (num_slots * steps * block_rows) != rows
    strip_rows = SUBLANE if block_rows % SUBLANE == 0 else block_rows

    kernel = _make_sum_kernel(elem_fn, block_rows, lane, strip_rows, rows,
                              needs_mask, final_scale)

    if num_slots * steps > nblocks:
        # Extra slot iterations map onto the last real block (in-bounds DMA);
        # the in-kernel row mask zeroes their contribution.
        def idx(s, i):
            return (jnp.minimum(s * steps + i, nblocks - 1), 0)
    else:
        def idx(s, i):
            return (s * steps + i, 0)

    itemsize = jnp.dtype(a.dtype).itemsize
    cost = pl.CostEstimate(
        flops=flops_per_elem * n,
        transcendentals=transcendentals_per_elem * n,
        bytes_accessed=2 * n * itemsize + 4 * num_slots)

    partials = pl.pallas_call(
        kernel,
        out_shape=jax.ShapeDtypeStruct((num_slots, 1), jnp.float32),
        grid=(num_slots, steps),
        in_specs=[
            pl.BlockSpec((block_rows, lane), idx),
            pl.BlockSpec((block_rows, lane), idx),
        ],
        out_specs=pl.BlockSpec((1, 1), lambda s, i: (s, 0),
                               memory_space=pltpu.SMEM),
        scratch_shapes=[pltpu.VMEM((strip_rows, lane), jnp.float32)],
        compiler_params=pltpu.CompilerParams(
            dimension_semantics=("parallel", "arbitrary"),
            vmem_limit_bytes=VMEM_LIMIT_BYTES),
        cost_estimate=cost,
    )(av, bv)
    return jnp.sum(partials)


def abs_diff_sum(x, x_rec):
    return _tiled_pair_sum(_abs_elem, 1.0, x, x_rec,
                           flops_per_elem=3, transcendentals_per_elem=0)


def kl_sum(mean, logvar_post):
    n = int(np.prod(mean.shape))
    if n < SMALL_KL_ELEMS:
        # Latents are typically tiny; a second pallas_call launch would cost
        # more than its HBM time.  Single fused XLA reduce instead.
        mu = mean.astype(jnp.float32)
        lv = jnp.clip(logvar_post.astype(jnp.float32), -30.0, 20.0)
        return 0.5 * jnp.sum(mu * mu + jnp.exp(lv) - 1.0 - lv)
    return _tiled_pair_sum(_kl_elem, 0.5, mean, logvar_post,
                           flops_per_elem=7, transcendentals_per_elem=1)


# ----------------------------------------------------------------------------
# Loss (both reductions under one jit so any launches overlap)
# ----------------------------------------------------------------------------
@jax.jit
def _loss_core(inputs, reconstructions, post_mean, post_logvar, logvar, kl_weight):
    batch = inputs.shape[0]
    n_elem = float(np.prod(inputs.shape))
    lv = logvar.astype(jnp.float32)

    sum_abs = abs_diff_sum(inputs, reconstructions)
    kl_total = kl_sum(post_mean, post_logvar)

    # sum(rec / exp(lv) + lv) == sum(rec) * exp(-lv) + lv * numel   (lv scalar)
    sum_nll = sum_abs * jnp.exp(-lv) + lv * n_elem
    nll_loss = sum_nll / batch
    kl_loss = kl_total / batch
    rec_loss_mean = sum_abs / n_elem
    loss = nll_loss + kl_weight * kl_loss
    return loss, nll_loss, kl_loss, rec_loss_mean


# ----------------------------------------------------------------------------
# Module-equivalent wrappers
# ----------------------------------------------------------------------------
class DiagonalGaussianPosterior:
    """Minimal JAX stand-in for ldm's DiagonalGaussianDistribution (moments only)."""

    def __init__(self, parameters):          # (B, 2*Cz, h, w), NCHW
        self.mean, self.logvar = jnp.split(parameters, 2, axis=1)


class ReconstructionKLDLoss:
    def __init__(self, logvar_init=0.0, kl_weight=1.0):
        self.kl_weight = kl_weight
        # nn.Parameter(torch.ones(()) * logvar_init)
        self.logvar = jnp.array(logvar_init, dtype=jnp.float32)

    def __call__(self, inputs, reconstructions, posteriors, optimizer_idx,
                 global_step, last_layer=None, cond=None, split='train',
                 weights=None):
        # TODO(synk): `weights` is accepted but unused, matching the reference forward.
        loss, nll_loss, kl_loss, rec_loss_mean = _loss_core(
            inputs, reconstructions, posteriors.mean, posteriors.logvar,
            self.logvar, jnp.float32(self.kl_weight))
        log = {
            f'{split}/total_loss': loss,
            f'{split}/logvar': self.logvar,
            f'{split}/kl_loss': kl_loss,
            f'{split}/nll_loss': nll_loss,
            f'{split}/rec_loss': rec_loss_mean,
        }
        return loss, log


if __name__ == "__main__":
    key = jax.random.PRNGKey(0)
    k1, k2, k3 = jax.random.split(key, 3)

    # image-like tensors (NCHW) and latent posterior moments (NCHW, 2*Cz channels)
    B, C, H, W = 2, 4, 16, 16
    Cz, h, w = 4, 8, 8

    inputs = jax.random.normal(k1, (B, C, H, W), dtype=jnp.float32)
    reconstructions = jax.random.normal(k2, (B, C, H, W), dtype=jnp.float32)
    moments = jax.random.normal(k3, (B, 2 * Cz, h, w), dtype=jnp.float32)
    posteriors = DiagonalGaussianPosterior(moments)

    loss_mod = ReconstructionKLDLoss(logvar_init=0.0, kl_weight=1.0)
    loss, log = loss_mod(inputs, reconstructions, posteriors,
                         optimizer_idx=0, global_step=0, split='train')
    loss = jax.block_until_ready(loss)

    # pure-JAX reference check
    rec_ref = jnp.abs(inputs - reconstructions)
    nll_ref = jnp.sum(rec_ref / jnp.exp(loss_mod.logvar) + loss_mod.logvar) / B
    mu, lv = jnp.split(moments, 2, axis=1)
    lv = jnp.clip(lv, -30.0, 20.0)
    kl_ref = jnp.sum(0.5 * (mu ** 2 + jnp.exp(lv) - 1.0 - lv)) / B
    loss_ref = nll_ref + loss_mod.kl_weight * kl_ref

    assert np.allclose(np.asarray(loss), np.asarray(loss_ref),
                       rtol=1e-5, atol=1e-4), (float(loss), float(loss_ref))
    assert np.allclose(np.asarray(log['train/nll_loss']),
                       np.asarray(nll_ref), rtol=1e-5, atol=1e-4)
    assert np.allclose(np.asarray(log['train/rec_loss']),
                       np.asarray(jnp.mean(rec_ref)), rtol=1e-5, atol=1e-5)
    assert np.allclose(np.asarray(log['train/kl_loss']),
                       np.asarray(kl_ref), rtol=1e-5, atol=1e-4)

    print("KERNEL_OK")
</pallas_src>

<mosaic_0001>
module attributes {stable_mosaic.version = 11 : i64} {
  func.func @kernel(%arg0: i32, %arg1: i32, %arg2: memref<2x1024xf32, #tpu.memory_space<vmem>>, %arg3: memref<2x1024xf32, #tpu.memory_space<vmem>>, %arg4: memref<1x1xf32, #tpu.memory_space<smem>>, %arg5: memref<2x1024xf32, #tpu.memory_space<vmem>>) attributes {dimension_semantics = [#tpu.dimension_semantics<parallel>, #tpu.dimension_semantics<arbitrary>], iteration_bounds = array<i64: 1, 1>, scalar_prefetch = 0 : i64, scratch_operands = 1 : i64, tpu.core_type = #tpu.core_type<tc>, window_params = [{transform_indices = @transform_0, window_bounds = array<i64: 2, 1024>}, {transform_indices = @transform_1, window_bounds = array<i64: 2, 1024>}, {transform_indices = @transform_2, window_bounds = array<i64: 1, 1>}]} {
    %c0_i32 = arith.constant 0 : i32
    %0 = arith.cmpi eq, %arg1, %c0_i32 : i32
    %1 = arith.extui %0 : i1 to i32
    %c0_i32_0 = arith.constant 0 : i32
    %2 = arith.cmpi ne, %1, %c0_i32_0 : i32
    scf.if %2 {
      %cst = arith.constant 0.000000e+00 : f32
      %13 = vector.broadcast %cst : f32 to vector<2x1024xf32>
      %c0_10 = arith.constant 0 : index
      %c0_11 = arith.constant 0 : index
      %14 = vector.load %arg5[%c0_10, %c0_11] : memref<2x1024xf32, #tpu.memory_space<vmem>>, vector<2x1024xf32>
      tpu.vector_store %arg5[%c0_10, %c0_11], %13 {strides = array<i32>} : memref<2x1024xf32, #tpu.memory_space<vmem>>, vector<2x1024xf32>,
    } else {
    }
    %c0 = arith.constant 0 : index
    %c0_1 = arith.constant 0 : index
    %3 = vector.load %arg2[%c0, %c0_1] : memref<2x1024xf32, #tpu.memory_space<vmem>>, vector<2x1024xf32>
    %c0_2 = arith.constant 0 : index
    %c0_3 = arith.constant 0 : index
    %4 = vector.load %arg3[%c0_2, %c0_3] : memref<2x1024xf32, #tpu.memory_space<vmem>>, vector<2x1024xf32>
    %5 = arith.subf %3, %4 : vector<2x1024xf32>
    %6 = math.absf %5 : vector<2x1024xf32>
    %c0_4 = arith.constant 0 : index
    %c0_5 = arith.constant 0 : index
    %7 = vector.load %arg5[%c0_4, %c0_5] : memref<2x1024xf32, #tpu.memory_space<vmem>>, vector<2x1024xf32>
    %8 = arith.addf %7, %6 : vector<2x1024xf32>
    %c0_6 = arith.constant 0 : index
    %c0_7 = arith.constant 0 : index
    %9 = vector.load %arg5[%c0_6, %c0_7] : memref<2x1024xf32, #tpu.memory_space<vmem>>, vector<2x1024xf32>
    tpu.vector_store %arg5[%c0_6, %c0_7], %8 {strides = array<i32>} : memref<2x1024xf32, #tpu.memory_space<vmem>>, vector<2x1024xf32>,
    %c0_i32_8 = arith.constant 0 : i32
    %10 = arith.cmpi eq, %arg1, %c0_i32_8 : i32
    %11 = arith.extui %10 : i1 to i32
    %c0_i32_9 = arith.constant 0 : i32
    %12 = arith.cmpi ne, %11, %c0_i32_9 : i32
    scf.if %12 {
      %c0_10 = arith.constant 0 : index
      %c0_11 = arith.constant 0 : index
      %13 = vector.load %arg5[%c0_10, %c0_11] : memref<2x1024xf32, #tpu.memory_space<vmem>>, vector<2x1024xf32>
      %14 = vector.shape_cast %13 : vector<2x1024xf32> to vector<1x2x1024xf32>
      %cst = arith.constant dense<0.000000e+00> : vector<1xf32>
      %15 = vector.multi_reduction <add>, %14, %cst [1, 2] : vector<1x2x1024xf32> to vector<1xf32>
      %16 = vector.shape_cast %15 : vector<1xf32> to vector<1x1x1xf32>
      %17 = vector.extract %16[0, 0, 0] : f32 from vector<1x1x1xf32>
      %c0_12 = arith.constant 0 : index
      %c0_13 = arith.constant 0 : index
      %18 = memref.load %arg4[%c0_12, %c0_13] : memref<1x1xf32, #tpu.memory_space<smem>>
      memref.store %17, %arg4[%c0_12, %c0_13] : memref<1x1xf32, #tpu.memory_space<smem>>
    } else {
    }
    return
  }
  func.func @transform_0(%arg0: i32, %arg1: i32) -> (i32, i32) {
    %c1_i32 = arith.constant 1 : i32
    %0 = arith.muli %arg0, %c1_i32 : i32
    %1 = arith.addi %0, %arg1 : i32
    %c0_i32 = arith.constant 0 : i32
    %c0_i32_0 = arith.constant 0 : i32
    return %1, %c0_i32 : i32, i32
  }
  func.func @transform_1(%arg0: i32, %arg1: i32) -> (i32, i32) {
    %c1_i32 = arith.constant 1 : i32
    %0 = arith.muli %arg0, %c1_i32 : i32
    %1 = arith.addi %0, %arg1 : i32
    %c0_i32 = arith.constant 0 : i32
    %c0_i32_0 = arith.constant 0 : i32
    return %1, %c0_i32 : i32, i32
  }
  func.func @transform_2(%arg0: i32, %arg1: i32) -> (i32, i32) {
    %c0_i32 = arith.constant 0 : i32
    %c0_i32_0 = arith.constant 0 : i32
    return %arg0, %c0_i32 : i32, i32
  }
}

</mosaic_0001>

<bundles_post_ra>
// kernel: _loss_core.1
= control target key start
LH: loop header
LB: loop body
LE: loop exit
PB: predicated region body
PF: predicated region fallthrough
CT: control target
= control target key end

     0   :  { %v83_v3 = vlaneseq  ;;  %v189_v6 = vmov 1983009808   ;;  %s238_s0 = inlined_call_operand.vmem [shape: f32[2,1024], index: 0, kind: input, shape index: {}]   ;;  %s239_s1 = inlined_call_operand.vmem [shape: f32[2,1024], index: 1, kind: input, shape index: {}]   ;;  %s240_s2 = inlined_call_operand.hbm [shape: f32[1,1], index: 2, kind: output, shape index: {}]  }
   0x1   :  { %v58_v0 = vld [vmem:[%s238_s0] sm:$0xff]  ;;  %v59_v1 = vld [vmem:[%s238_s0 + $0x8] sm:$0xff]  ;;  %v81_v7 = vunpack.c.l.s4 %v189_v6 }
   0x2   :  { %v60_v2 = vld [vmem:[%s239_s1] sm:$0xff]  ;;  %v61_v4 = vld [vmem:[%s239_s1 + $0x8] sm:$0xff] }
   0x3   :  { %v62_v5 = vsub.f32 %v58_v0, %v60_v2 }
   0x4   :  { %7 = vsyncpa [#allocation4], 0  ;;  %v63_v8 = vsub.f32 %v59_v1, %v61_v4  ;;  %v84_v9 = vshrl.u32 %v83_v3, 7  ;;  %v82_v11 = vunpack.c.0.s8 %v81_v7  ;;  %vm121_vm0 = vcmask 1041408   ;;  %s177_s18 = scalar_lea.hbm %s240_s2, 16 }
   0x5   :  { %v64_v10 = vand.u32 2147483647, %v62_v5  ;;  %p178_p0 = scmp.ne.s32.totalorder %s240_s2, %s177_s18  ;;  %p181_p1 = scmp.lt.u32.totalorder %s177_s18, %s240_s2 }
   0x6   :  { %v65_v12 = vand.u32 2147483647, %v63_v8  ;;  %v85_v14 = vsub.s32 %v82_v11, %v84_v9 }
   0x7   :  { %v79_v13 = vcombine.high %v64_v10, %v64_v10  ;;  %p183_p2 = pnand %p181_p1, %p178_p0 }
   0x8   :  { %v86_v15 = vrot.slane %v64_v10, %v85_v14  ;;  %v96_v17 = vcombine.high %v65_v12, %v65_v12  ;;  %v103_v20 = vrot.slane %v65_v12, %v85_v14 }
   0x9   :  { %v93_v16 = vrot.slane %v79_v13, %v85_v14 }
   0xa   :  { %v94_v18 = vcombine.high %v86_v15, %v86_v15  ;;  %v122_v21 = vsel %vm121_vm0, %v86_v15, 0.0  ;;  %v110_v25 = vrot.slane %v96_v17, %v85_v14  ;;  %v111_v26 = vcombine.high %v103_v20, %v103_v20 }
   0xb   :  { %v95_v19 = vcombine.high %v93_v16, %v93_v16  ;;  %v125_v23 = vsel %vm121_vm0, %v93_v16, 0.0  ;;  %v129_v29 = vsel %vm121_vm0, %v103_v20, 0.0 }
   0xc   :  { %v123_v22 = vsel %vm121_vm0, %v94_v18, 0.0  ;;  %v112_v31 = vcombine.high %v110_v25, %v110_v25  ;;  %v131_v32 = vsel %vm121_vm0, %v111_v26, 0.0  ;;  %v133_v34 = vsel %vm121_vm0, %v110_v25, 0.0 }
   0xd   :  { %v124_v24 = vadd.f32 %v123_v22, %v122_v21  ;;  %v127_v27 = vsel %vm121_vm0, %v95_v19, 0.0 }
   0xe   :  { %v135_v36 = vsel %vm121_vm0, %v112_v31, 0.0 }
   0xf   :  { %v126_v28 = vadd.f32 %v125_v23, %v124_v24 }
  0x11   :  { %v128_v30 = vadd.f32 %v127_v27, %v126_v28 }
  0x13   :  { %v130_v33 = vadd.f32 %v129_v29, %v128_v30 }
  0x15   :  { %v132_v35 = vadd.f32 %v131_v32, %v130_v33 }
  0x17   :  { %v134_v37 = vadd.f32 %v133_v34, %v132_v35 }
  0x19   :  { %v136_v38 = vadd.f32 %v135_v36, %v134_v37 }
  0x1b   :  { %137 = vadd.xlane.f32.xlu0 %v136_v38 }
  0xa8   :  { %v138_v39 = vpop.xlane.xlu0 %137 }
  0xa9   :  { %v139_v40 = vrot.slane %v138_v39, 4 }
  0xab   :  { %v140_v41 = vadd.f32 %v139_v40, %v138_v39 }
  0xad   :  { %v141_v42 = vrot.slane %v140_v41, 2 }
  0xaf   :  { %v142_v43 = vadd.f32 %v141_v42, %v140_v41 }
  0xb1   :  { %v143_v44 = vrot.slane %v142_v43, 1 }
  0xb3   :  { %v144_v45 = vadd.f32 %v143_v44, %v142_v43 }
  0xb5   :  { %173 = vpush %v144_v45 }
  0xe6   :  { %s174_s0 = spop %173 }
  0xe7   :  { %147 = sst [smem:[#allocation3]] %s174_s0 }
  0xe8   :  { %186 = shalt.err (!%p183_p2)
}
  0xe9   :  { %s190_s23 = smov [#allocation3]  }
  0xea   :  { %155 = dma.smem_to_hbm %s190_s23, 16, %s240_s2, [#allocation4]  }
  0xeb   :  { %187 = dma.done.wait [#allocation4], 16  }
  0xec   :  { %188 = vsyncadd [#allocation4], 4294967280 }
  0xed   :  { %159 = sfence }
  0xee   :  { %160 = vsyncpa [#allocation4], 1 }

</bundles_post_ra>
